<compile_context>
chip_gen: v7x
topology: tpu7x:2x2x1
jax: 0.10.0
libtpu: 0.0.40
codegen_flags: <defaults>
</compile_context>

<pallas_src>
import functools

import jax
import jax.numpy as jnp
from jax.experimental import pallas as pl
from jax.experimental.pallas import tpu as pltpu


def _wbce_kernel(wpos_ref, wneg_ref, out_ref, tgt_ref, loss_ref, acc_ref,
                 *, tile_n, tiles_per_core, n_rows):
    p = pl.program_id(0)   # core split ("parallel")
    i = pl.program_id(1)   # batch tiles ("arbitrary" reduction axis)

    @pl.when(i == 0)
    def _init():
        acc_ref[...] = jnp.zeros_like(acc_ref)

    eps = 1e-10
    o = out_ref[...].astype(jnp.float32)   # [C, TN]  (upcast from native dtype)
    t = tgt_ref[...].astype(jnp.float32)   # [C, TN]
    w_pos = wpos_ref[...]                  # [C, 1], lane-broadcasts over TN
    w_neg = wneg_ref[...]                  # [C, 1]

    # TODO(synk): if targets are guaranteed binary {0,1}, a single
    # log(where(t > 0.5, o, 1 - o)) would halve EUP work; two logs are kept so
    # soft targets behave exactly like the reference module.
    loss = (w_pos * (t * jnp.log(o + eps))
            + w_neg * ((1.0 - t) * jnp.log(1.0 - o + eps)))

    # Mask batch columns outside the true batch (ragged last tile / phantom tiles
    # from an uneven 2-core split). `where` is a select, so garbage (even NaN) in
    # out-of-range columns never reaches the accumulator.
    logical_tile = p * tiles_per_core + i
    col = logical_tile * tile_n + jax.lax.broadcasted_iota(jnp.int32, (1, tile_n), 1)
    loss = jnp.where(col < n_rows, loss, 0.0)

    # Steady-state work stays on the VPU (plain += into a persistent accumulator).
    acc_ref[...] += loss

    @pl.when(i == pl.num_programs(1) - 1)
    def _finalize():
        total = jnp.sum(acc_ref[...])            # single XLU reduction per core
        val = total * (-1.0 / n_rows)            # -(sum / global N)
        loss_ref[...] = jnp.zeros((1, 1, 128), jnp.float32) + val


def weighted_bce(output, target, pos, neg, *, max_tile_n=32768):
    """output, target: [n, 14]; pos, neg: [14]. Returns scalar f32 loss."""
    n, c = output.shape

    # Precompute class weights once in plain JAX (removes per-step divides).
    pos_f = jnp.asarray(pos, jnp.float32).reshape(c, 1)
    neg_f = jnp.asarray(neg, jnp.float32).reshape(c, 1)
    denom = pos_f + neg_f
    w_pos = neg_f / denom
    w_neg = pos_f / denom

    # Lane-dense layout: batch on the 128-wide lane axis, 14 classes on sublanes.
    # (Layout plumbing only; ideally the producer would emit [C, N] directly.)
    out_t = output.T   # [c, n], native dtype
    tgt_t = target.T   # [c, n]

    if n < 128:
        tile_n = n                                   # full-array block
    else:
        tile_n = min(max_tile_n, (n // 128) * 128)   # multiple of 128 lanes
    num_tiles = pl.cdiv(n, tile_n)

    # v7x megacore: shard batch tiles across 2 TensorCores when there is enough work.
    num_cores = 2 if num_tiles >= 2 else 1
    tiles_per_core = pl.cdiv(num_tiles, num_cores)

    def data_idx(p, i):
        # Clamp so a phantom tile (uneven core split) never DMAs out of bounds;
        # its contribution is masked to zero inside the kernel.
        return (0, jnp.minimum(p * tiles_per_core + i, num_tiles - 1))

    kernel = functools.partial(_wbce_kernel, tile_n=tile_n,
                               tiles_per_core=tiles_per_core, n_rows=n)

    partials = pl.pallas_call(
        kernel,
        out_shape=jax.ShapeDtypeStruct((num_cores, 1, 128), jnp.float32),
        grid=(num_cores, tiles_per_core),
        in_specs=[
            pl.BlockSpec((c, 1), lambda p, i: (0, 0)),   # w_pos
            pl.BlockSpec((c, 1), lambda p, i: (0, 0)),   # w_neg
            pl.BlockSpec((c, tile_n), data_idx),         # output^T
            pl.BlockSpec((c, tile_n), data_idx),         # target^T
        ],
        out_specs=pl.BlockSpec((1, 1, 128), lambda p, i: (p, 0, 0)),
        scratch_shapes=[pltpu.VMEM((c, tile_n), jnp.float32)],
        compiler_params=pltpu.CompilerParams(
            dimension_semantics=("parallel", "arbitrary")),
    )(w_pos, w_neg, out_t, tgt_t)

    # Each core contributed -(partial_sum / n); summing partials gives the full mean.
    return jnp.sum(partials[:, 0, 0])


def weighted_bce_ref(output, target, pos, neg):
    eps = 1e-10
    w_pos = neg / (pos + neg)
    w_neg = pos / (pos + neg)
    loss = w_pos * (target * jnp.log(output + eps)) + w_neg * (
        (1.0 - target) * jnp.log(1.0 - output + eps)
    )
    return -jnp.mean(jnp.sum(loss, axis=1))


if __name__ == "__main__":
    key = jax.random.PRNGKey(0)
    c = 14
    # deterministic class-frequency weights (module __init__ args)
    pos = jnp.arange(1.0, c + 1.0, dtype=jnp.float32)                       # [14]
    neg = jnp.float32(2.0) * jnp.arange(c, 0.0, -1.0, dtype=jnp.float32)    # [14]

    # n=8   -> single full-array block (original small case)
    # n=300 -> gridded path: 2 tiles, 2-core split, ragged/masked last tile
    for n in (8, 300):
        k1, k2, key = jax.random.split(key, 3)
        output = jax.nn.sigmoid(jax.random.normal(k1, (n, c), dtype=jnp.float32))
        target = (jax.random.uniform(k2, (n, c)) > 0.5).astype(jnp.float32)

        loss = jax.block_until_ready(weighted_bce(output, target, pos, neg))
        ref = weighted_bce_ref(output, target, pos, neg)
        assert jnp.allclose(loss, ref, rtol=1e-4, atol=1e-5), (n, loss, ref)

    print("KERNEL_OK")
</pallas_src>

<mosaic_0001>
module attributes {stable_mosaic.version = 11 : i64} {
  func.func @_wbce_kernel(%arg0: i32, %arg1: i32, %arg2: memref<14x1xf32, #tpu.memory_space<vmem>>, %arg3: memref<14x1xf32, #tpu.memory_space<vmem>>, %arg4: memref<14x8xf32, #tpu.memory_space<vmem>>, %arg5: memref<14x8xf32, #tpu.memory_space<vmem>>, %arg6: memref<1x1x128xf32, #tpu.memory_space<vmem>>, %arg7: memref<14x8xf32, #tpu.memory_space<vmem>>) attributes {dimension_semantics = [#tpu.dimension_semantics<parallel>, #tpu.dimension_semantics<arbitrary>], iteration_bounds = array<i64: 1, 1>, scalar_prefetch = 0 : i64, scratch_operands = 1 : i64, tpu.core_type = #tpu.core_type<tc>, window_params = [{pipeline_mode = #tpu.pipeline_mode<synchronous>, transform_indices = @transform_0, window_bounds = array<i64: 14, 1>}, {pipeline_mode = #tpu.pipeline_mode<synchronous>, transform_indices = @transform_1, window_bounds = array<i64: 14, 1>}, {transform_indices = @transform_2, window_bounds = array<i64: 14, 8>}, {transform_indices = @transform_3, window_bounds = array<i64: 14, 8>}, {transform_indices = @transform_4, window_bounds = array<i64: 1, 1, 128>}]} {
    %c0_i32 = arith.constant 0 : i32
    %0 = arith.cmpi eq, %arg1, %c0_i32 : i32
    %1 = arith.extui %0 : i1 to i32
    %c0_i32_0 = arith.constant 0 : i32
    %2 = arith.cmpi ne, %1, %c0_i32_0 : i32
    scf.if %2 {
      %cst_19 = arith.constant 0.000000e+00 : f32
      %42 = vector.broadcast %cst_19 : f32 to vector<14x8xf32>
      %c0_20 = arith.constant 0 : index
      %c0_21 = arith.constant 0 : index
      %43 = vector.load %arg7[%c0_20, %c0_21] : memref<14x8xf32, #tpu.memory_space<vmem>>, vector<14x8xf32>
      tpu.vector_store %arg7[%c0_20, %c0_21], %42 {strides = array<i32>} : memref<14x8xf32, #tpu.memory_space<vmem>>, vector<14x8xf32>,
    } else {
    }
    %c0 = arith.constant 0 : index
    %c0_1 = arith.constant 0 : index
    %3 = vector.load %arg4[%c0, %c0_1] : memref<14x8xf32, #tpu.memory_space<vmem>>, vector<14x8xf32>
    %c0_2 = arith.constant 0 : index
    %c0_3 = arith.constant 0 : index
    %4 = vector.load %arg5[%c0_2, %c0_3] : memref<14x8xf32, #tpu.memory_space<vmem>>, vector<14x8xf32>
    %c0_4 = arith.constant 0 : index
    %c0_5 = arith.constant 0 : index
    %5 = vector.load %arg2[%c0_4, %c0_5] : memref<14x1xf32, #tpu.memory_space<vmem>>, vector<14x1xf32>
    %c0_6 = arith.constant 0 : index
    %c0_7 = arith.constant 0 : index
    %6 = vector.load %arg3[%c0_6, %c0_7] : memref<14x1xf32, #tpu.memory_space<vmem>>, vector<14x1xf32>
    %cst = arith.constant 1.000000e-10 : f32
    %7 = vector.broadcast %cst : f32 to vector<14x8xf32>
    %8 = arith.addf %3, %7 : vector<14x8xf32>
    %9 = math.log %8 : vector<14x8xf32>
    %10 = arith.mulf %4, %9 : vector<14x8xf32>
    %11 = vector.broadcast %5 : vector<14x1xf32> to vector<14x8xf32>
    %12 = arith.mulf %11, %10 : vector<14x8xf32>
    %cst_8 = arith.constant 1.000000e+00 : f32
    %13 = vector.broadcast %cst_8 : f32 to vector<14x8xf32>
    %14 = arith.subf %13, %4 : vector<14x8xf32>
    %cst_9 = arith.constant 1.000000e+00 : f32
    %15 = vector.broadcast %cst_9 : f32 to vector<14x8xf32>
    %16 = arith.subf %15, %3 : vector<14x8xf32>
    %cst_10 = arith.constant 1.000000e-10 : f32
    %17 = vector.broadcast %cst_10 : f32 to vector<14x8xf32>
    %18 = arith.addf %16, %17 : vector<14x8xf32>
    %19 = math.log %18 : vector<14x8xf32>
    %20 = arith.mulf %14, %19 : vector<14x8xf32>
    %21 = vector.broadcast %6 : vector<14x1xf32> to vector<14x8xf32>
    %22 = arith.mulf %21, %20 : vector<14x8xf32>
    %23 = arith.addf %12, %22 : vector<14x8xf32>
    %c1_i32 = arith.constant 1 : i32
    %24 = arith.muli %arg0, %c1_i32 : i32
    %25 = arith.addi %24, %arg1 : i32
    %c8_i32 = arith.constant 8 : i32
    %26 = arith.muli %25, %c8_i32 : i32
    %27 = tpu.iota {dimensions = array<i32: 1>} : vector<1x8xi32>
    %28 = vector.broadcast %26 : i32 to vector<1x8xi32>
    %29 = arith.addi %28, %27 : vector<1x8xi32>
    %c8_i32_11 = arith.constant 8 : i32
    %30 = vector.broadcast %c8_i32_11 : i32 to vector<1x8xi32>
    %31 = arith.cmpi slt, %29, %30 : vector<1x8xi32>
    %cst_12 = arith.constant 0.000000e+00 : f32
    %32 = vector.shape_cast %31 : vector<1x8xi1> to vector<1x8xi1>
    %33 = vector.broadcast %32 : vector<1x8xi1> to vector<14x8xi1>
    %34 = vector.broadcast %cst_12 : f32 to vector<14x8xf32>
    %35 = arith.select %33, %23, %34 : vector<14x8xi1>, vector<14x8xf32>
    %c0_13 = arith.constant 0 : index
    %c0_14 = arith.constant 0 : index
    %36 = vector.load %arg7[%c0_13, %c0_14] : memref<14x8xf32, #tpu.memory_space<vmem>>, vector<14x8xf32>
    %37 = arith.addf %36, %35 : vector<14x8xf32>
    %c0_15 = arith.constant 0 : index
    %c0_16 = arith.constant 0 : index
    %38 = vector.load %arg7[%c0_15, %c0_16] : memref<14x8xf32, #tpu.memory_space<vmem>>, vector<14x8xf32>
    tpu.vector_store %arg7[%c0_15, %c0_16], %37 {strides = array<i32>} : memref<14x8xf32, #tpu.memory_space<vmem>>, vector<14x8xf32>,
    %c0_i32_17 = arith.constant 0 : i32
    %39 = arith.cmpi eq, %arg1, %c0_i32_17 : i32
    %40 = arith.extui %39 : i1 to i32
    %c0_i32_18 = arith.constant 0 : i32
    %41 = arith.cmpi ne, %40, %c0_i32_18 : i32
    scf.if %41 {
      %c0_19 = arith.constant 0 : index
      %c0_20 = arith.constant 0 : index
      %42 = vector.load %arg7[%c0_19, %c0_20] : memref<14x8xf32, #tpu.memory_space<vmem>>, vector<14x8xf32>
      %43 = vector.shape_cast %42 : vector<14x8xf32> to vector<1x14x8xf32>
      %cst_21 = arith.constant dense<0.000000e+00> : vector<1xf32>
      %44 = vector.multi_reduction <add>, %43, %cst_21 [1, 2] : vector<1x14x8xf32> to vector<1xf32>
      %45 = vector.shape_cast %44 : vector<1xf32> to vector<1x1x1xf32>
      %46 = vector.extract %45[0, 0, 0] : f32 from vector<1x1x1xf32>
      %cst_22 = arith.constant -1.250000e-01 : f32
      %47 = arith.mulf %46, %cst_22 : f32
      %cst_23 = arith.constant 0.000000e+00 : f32
      %48 = vector.broadcast %cst_23 : f32 to vector<1x1x128xf32>
      %49 = vector.broadcast %47 : f32 to vector<1x1x128xf32>
      %50 = arith.addf %48, %49 : vector<1x1x128xf32>
      %c0_24 = arith.constant 0 : index
      %c0_25 = arith.constant 0 : index
      %c0_26 = arith.constant 0 : index
      %51 = vector.load %arg6[%c0_24, %c0_25, %c0_26] : memref<1x1x128xf32, #tpu.memory_space<vmem>>, vector<1x1x128xf32>
      tpu.vector_store %arg6[%c0_24, %c0_25, %c0_26], %50 {strides = array<i32>} : memref<1x1x128xf32, #tpu.memory_space<vmem>>, vector<1x1x128xf32>,
    } else {
    }
    return
  }
  func.func @transform_0(%arg0: i32, %arg1: i32) -> (i32, i32) {
    %c0_i32 = arith.constant 0 : i32
    %c0_i32_0 = arith.constant 0 : i32
    %c0_i32_1 = arith.constant 0 : i32
    return %c0_i32, %c0_i32_0 : i32, i32
  }
  func.func @transform_1(%arg0: i32, %arg1: i32) -> (i32, i32) {
    %c0_i32 = arith.constant 0 : i32
    %c0_i32_0 = arith.constant 0 : i32
    %c0_i32_1 = arith.constant 0 : i32
    return %c0_i32, %c0_i32_0 : i32, i32
  }
  func.func @transform_2(%arg0: i32, %arg1: i32) -> (i32, i32) {
    %c1_i32 = arith.constant 1 : i32
    %0 = arith.muli %arg0, %c1_i32 : i32
    %1 = arith.addi %0, %arg1 : i32
    %c0_i32 = arith.constant 0 : i32
    %2 = arith.minsi %1, %c0_i32 : i32
    %c0_i32_0 = arith.constant 0 : i32
    %c0_i32_1 = arith.constant 0 : i32
    return %c0_i32_0, %2 : i32, i32
  }
  func.func @transform_3(%arg0: i32, %arg1: i32) -> (i32, i32) {
    %c1_i32 = arith.constant 1 : i32
    %0 = arith.muli %arg0, %c1_i32 : i32
    %1 = arith.addi %0, %arg1 : i32
    %c0_i32 = arith.constant 0 : i32
    %2 = arith.minsi %1, %c0_i32 : i32
    %c0_i32_0 = arith.constant 0 : i32
    %c0_i32_1 = arith.constant 0 : i32
    return %c0_i32_0, %2 : i32, i32
  }
  func.func @transform_4(%arg0: i32, %arg1: i32) -> (i32, i32, i32) {
    %c0_i32 = arith.constant 0 : i32
    %c0_i32_0 = arith.constant 0 : i32
    %c0_i32_1 = arith.constant 0 : i32
    return %arg0, %c0_i32, %c0_i32_0 : i32, i32, i32
  }
}

</mosaic_0001>

<bundles_post_ra>
// kernel: tpu_custom_call.1
= control target key start
LH: loop header
LB: loop body
LE: loop exit
PB: predicated region body
PF: predicated region fallthrough
CT: control target
= control target key end

     0   :  { %vm76_vm0 = vcmask 64512   ;;  %v239_v2 = vmov 0   ;;  %v240_v3 = vmov 0.0   ;;  %vm78_vm1 = vcmask 62464   ;;  %s309_s0 = inlined_call_operand.vmem [shape: f32[14,1], index: 0, kind: input, shape index: {}]   ;;  %s310_s1 = inlined_call_operand.vmem [shape: f32[14,1], index: 1, kind: input, shape index: {}]   ;;  %s311_s2 = inlined_call_operand.vmem [shape: f32[14,8], index: 2, kind: input, shape index: {}]   ;;  %s312_s3 = inlined_call_operand.vmem [shape: f32[14,8], index: 3, kind: input, shape index: {}]   ;;  %s313_s4 = inlined_call_operand.hbm [shape: f32[1,1,128], index: 4, kind: output, shape index: {}]  }
   0x1   :  { %v86_v0 = vld [vmem:[%s310_s1] sm:$0xff]  ;;  %206 = vset.pattern.permute.xlu1 %v239_v2  ;;  %205 = vset.pattern.permute.xlu0 %v239_v2  ;;  %77 = vst.msk [vmem:[#allocation2] sm:$0xff] %vm76_vm0, %v240_v3  ;;  %v87_v4 = vld [vmem:[%s310_s1 + $0x8] sm:$0x3f] }
   0x2   :  { %v84_v1 = vld [vmem:[%s309_s0] sm:$0xff]  ;;  %122 = vperm.xlu1 %206, %v86_v0   ;;  %v85_v5 = vld [vmem:[%s309_s0 + $0x8] sm:$0x3f] }
   0x3   :  { %98 = vperm.xlu0 %205, %v84_v1  }
   0x4   :  { %9 = vsyncpa [#allocation4], 0  ;;  %79 = vst.msk [vmem:[#allocation2 + $0x8] sm:$0x3f] %vm78_vm1, %v240_v3  ;;  %v80_v6 = vld [vmem:[%s311_s2] sm:$0xff]  ;;  %v136_v23 = vlaneseq }
   0x5   :  { %v110_v7 = vsub.f32 1.0, %v80_v6  ;;  %v81_v8 = vld [vmem:[%s311_s2 + $0x8] sm:$0x3f]  ;;  %v88_v9 = vadd.f32 1e-10, %v80_v6  ;;  %v82_v15 = vld [vmem:[%s312_s3] sm:$0xff] }
   0x6   :  { %127 = vperm.xlu1 %206, %v87_v4   ;;  %v111_v11 = vsub.f32 1.0, %v81_v8  ;;  %v89_v12 = vadd.f32 1e-10, %v81_v8  ;;  %v108_v17 = vsub.f32 1.0, %v82_v15  ;;  %v83_v21 = vld [vmem:[%s312_s3 + $0x8] sm:$0x3f] }
   0x7   :  { %103 = vperm.xlu0 %205, %v85_v5   ;;  %v112_v10 = vadd.f32 1e-10, %v110_v7  ;;  %207 = vlog2.f32 %v88_v9  ;;  %v109_v24 = vsub.f32 1.0, %v83_v21  ;;  %v137_v29 = vand.u32 127, %v136_v23  ;;  %s241_s3 = smov [#allocation3]  }
   0x8   :  { %v113_v13 = vadd.f32 1e-10, %v111_v11  ;;  %v145_v37 = vld [vmem:[#allocation2] sm:$0xff]  ;;  %s180_s28 = sshll.u32 %s241_s3, 4  ;;  %s181_s28 = int_to_ptr.vmem [resolvable:$true] %s180_s28 }
   0x9   :  { %209 = vlog2.f32 %v112_v10  ;;  %vm140_vm2 = vcmp.lt.s32.totalorder %v137_v29, 8  ;;  %s215_s5 = scalar_lea.vmem %s181_s28, 16  ;;  %s219_s6 = scalar_lea.vmem %s181_s28, 32 }
   0xa   :  { %211 = vlog2.f32 %v89_v12  ;;  %p216_p0 = scmp.ne.s32.totalorder %s181_s28, %s215_s5  ;;  %p220_p1 = scmp.lt.s32.totalorder %s181_s28, %s181_s28 }
   0xb   :  { %213 = vlog2.f32 %v113_v13  ;;  %v146_v45 = vld [vmem:[#allocation2 + $0x8] sm:$0x3f]  ;;  %p221_p2 = scmp.lt.s32.totalorder %s219_s6, %s215_s5 }
   0xd   :  { %p222_p3 = por %p221_p2, %p220_p1 }
   0xf   :  { %p223_p4 = pnand %p222_p3, %p216_p0 }
  0x11   :  { %v208_v14 = vpop.eup %207 }
  0x12   :  { %v91_v20 = vmul.f32 0.6931472, %v208_v14 }
  0x13   :  { %v210_v16 = vpop.eup %209 }
  0x14   :  { %v212_v18 = vpop.eup %211  ;;  %v115_v19 = vmul.f32 0.6931472, %v210_v16  ;;  %v94_v26 = vmul.f32 %v91_v20, %v82_v15 }
  0x15   :  { %v214_v22 = vpop.eup %213  ;;  %v93_v28 = vmul.f32 0.6931472, %v212_v18 }
  0x16   :  { %v118_v25 = vmul.f32 %v115_v19, %v108_v17  ;;  %v117_v27 = vmul.f32 0.6931472, %v214_v22 }
  0x17   :  { %v95_v35 = vmul.f32 %v93_v28, %v83_v21 }
  0x18   :  { %v119_v34 = vmul.f32 %v117_v27, %v109_v24 }
  0x81   :  { %v123_v30 = vpop.permute.xlu1 %122 }
  0x82   :  { %v99_v31 = vpop.permute.xlu0 %98  ;;  %v130_v32 = vmul.f32 %v123_v30, %v118_v25 }
  0x83   :  { %v106_v33 = vmul.f32 %v99_v31, %v94_v26 }
  0x85   :  { %v132_v36 = vadd.f32 %v130_v32, %v106_v33  ;;  %v128_v38 = vpop.permute.xlu1 %127 }
  0x86   :  { %v104_v39 = vpop.permute.xlu0 %103  ;;  %v131_v41 = vmul.f32 %v128_v38, %v119_v34 }
  0x87   :  { %v143_v40 = vsel %vm140_vm2, %v132_v36, 0.0  ;;  %v107_v42 = vmul.f32 %v104_v39, %v95_v35 }
  0x88   :  { %v147_v43 = vadd.f32 %v145_v37, %v143_v40 }
  0x89   :  { %v133_v44 = vadd.f32 %v131_v41, %v107_v42 }
  0x8a   :  { %150 = vst.msk [vmem:[#allocation2] sm:$0xff] %vm76_vm0, %v147_v43 }
  0x8b   :  { %v144_v46 = vsel %vm140_vm2, %v133_v44, 0.0 }
  0x8c   :  { %v148_v47 = vadd.f32 %v146_v45, %v144_v46 }
  0x8e   :  { %152 = vst.msk [vmem:[#allocation2 + $0x8] sm:$0x3f] %vm78_vm1, %v148_v47 }
  0x91   :  { %v156_v48 = vld [vmem:[#allocation2] sm:$0xff] }
  0x92   :  { %v158_v50 = vsel %vm76_vm0, %v156_v48, 0.0 }
  0x95   :  { %v157_v49 = vld [vmem:[#allocation2 + $0x8] sm:$0x3f] }
  0x96   :  { %v159_v51 = vsel %vm78_vm1, %v157_v49, 0.0 }
  0x97   :  { %v160_v52 = vadd.f32 %v159_v51, %v158_v50 }
  0x99   :  { %161 = vadd.xlane.f32.xlu0 %v160_v52 }
 0x126   :  { %v162_v53 = vpop.xlane.xlu0 %161 }
 0x127   :  { %v163_v54 = vrot.slane %v162_v53, 4 }
 0x129   :  { %v164_v55 = vadd.f32 %v163_v54, %v162_v53 }
 0x12b   :  { %v165_v56 = vrot.slane %v164_v55, 2 }
 0x12d   :  { %v166_v57 = vadd.f32 %v165_v56, %v164_v55 }
 0x12f   :  { %v167_v58 = vrot.slane %v166_v57, 1 }
 0x131   :  { %v168_v59 = vadd.f32 %v167_v58, %v166_v57 }
 0x133   :  { %200 = vpush %v168_v59 }
 0x164   :  { %s201_s29 = spop %200 }
 0x165   :  { %s170_s30 = smul.f32 -0.125, %s201_s29 }
 0x167   :  { %v171_v60 = vstv %s170_s30 }
 0x168   :  { %173 = vst [vmem:[#allocation3] sm:$0x1] %v171_v60 }
 0x169   :  { %226 = shalt.err (!%p223_p4)
}
 0x16a   :  { %s227_s9 = scalar_lea.hbm %s313_s4, 16 }
 0x16b   :  { %p228_p5 = scmp.ne.s32.totalorder %s313_s4, %s227_s9  ;;  %p231_p6 = scmp.lt.u32.totalorder %s227_s9, %s313_s4 }
 0x16d   :  { %p233_p7 = pnand %p231_p6, %p228_p5 }
 0x16f   :  { %236 = shalt.err (!%p233_p7)
}
 0x170   :  { %183 = dma.vmem_to_hbm [thread:$0]  %s181_s28, 16, %s313_s4, [#allocation4]  }
 0x171   :  { %237 = dma.done.wait [#allocation4], 16  }
 0x172   :  { %238 = vsyncadd [#allocation4], 4294967280 }
 0x173   :  { %187 = vsyncpa [#allocation4], 1 }

</bundles_post_ra>
